<compile_context>
chip_gen: v5e
topology: v5e:2x2
jax: 0.10.0
libtpu: 0.0.40
codegen_flags: <defaults>
</compile_context>

<pallas_src>
import jax
import jax.numpy as jnp
from jax.experimental import pallas as pl
from jax.experimental.pallas import tpu as pltpu

_LANE = 128  # TPU lane width; hidden/output widths are zero-padded to this.


def _cores_per_chip():
    """Best-effort TensorCores-per-device count (megacore detection)."""
    try:
        kind = jax.devices()[0].device_kind.lower()
    except Exception:
        return 1
    return 2 if ("v4" in kind or "v5p" in kind or "v7" in kind) else 1


def _round_up(x, m):
    return ((x + m - 1) // m) * m


def _make_kernel(n_in, out_w, compute_dtype):
    """Fused 3-layer MLP kernel. Weight slab layout (rows):
    [0:128) w1 (first n_in rows real), [128:256) w2, [256:384) w3."""

    def kernel(x_ref, w_ref, b_ref, o_ref):
        cd = compute_dtype
        x = x_ref[...].astype(cd)                              # (tb, n_in)
        w1 = w_ref[0:n_in, :]                                  # (n_in, 128)
        w2 = w_ref[_LANE:2 * _LANE, :]                         # (128, 128)
        w3 = w_ref[2 * _LANE:3 * _LANE, :]                     # (128, 128)
        b1 = b_ref[0:1, :]                                     # (1, 128) f32
        b2 = b_ref[1:2, :]
        b3 = b_ref[2:3, :]

        h1 = jnp.dot(x, w1, preferred_element_type=jnp.float32) + b1
        h1 = jnp.maximum(h1, 0.0)
        h2 = jnp.dot(h1.astype(cd), w2, preferred_element_type=jnp.float32) + b2
        h2 = jnp.maximum(h2, 0.0)
        h3 = jnp.dot(h2.astype(cd), w3, preferred_element_type=jnp.float32) + b3

        if out_w == _LANE:
            o_ref[...] = h3
        else:
            o_ref[...] = h3[:, :out_w]

    return kernel


def prepare_params(params, compute_dtype=jnp.float32):
    """One-time packing of torch-style params into kernel operands.

    params: dict with w1 (n_in, n1), b1 (1, n1), w2 (n1, n2), b2 (1, n2),
            w3 (n2, n3), b3 (1, n3).  Zero padding is exact: ReLU(0)=0 and zero
            weight rows/cols contribute nothing to the valid output columns.
    """
    w1, b1 = params["w1"], params["b1"]
    w2, b2 = params["w2"], params["b2"]
    w3, b3 = params["w3"], params["b3"]
    n_in, n1 = w1.shape
    n2 = w2.shape[1]
    n_out = w3.shape[1]
    assert n_in <= _LANE and n1 <= _LANE and n2 <= _LANE and n_out <= _LANE

    wslab = jnp.zeros((3 * _LANE, _LANE), compute_dtype)
    wslab = wslab.at[0:n_in, 0:n1].set(w1.astype(compute_dtype))
    wslab = wslab.at[_LANE:_LANE + n1, 0:n2].set(w2.astype(compute_dtype))
    wslab = wslab.at[2 * _LANE:2 * _LANE + n2, 0:n_out].set(w3.astype(compute_dtype))

    bpack = jnp.zeros((8, _LANE), jnp.float32)   # 8 rows -> one clean (8,128) tile
    bpack = bpack.at[0, 0:n1].set(b1[0].astype(jnp.float32))
    bpack = bpack.at[1, 0:n2].set(b2[0].astype(jnp.float32))
    bpack = bpack.at[2, 0:n_out].set(b3[0].astype(jnp.float32))

    return dict(wslab=wslab, bpack=bpack, n_in=n_in, n_out=n_out)


def network_forward(x, prepared, *, block_b=1024):
    """x: (B, n_in) float32. prepared: output of prepare_params()."""
    wslab = prepared["wslab"]
    bpack = prepared["bpack"]
    n_in = prepared["n_in"]
    n_out = prepared["n_out"]
    assert x.shape[-1] == n_in

    B = x.shape[0]
    cores = _cores_per_chip()
    steps = pl.cdiv(B, block_b)
    if cores > 1 and B >= 8 * cores:
        # Megacore: guarantee >= 2 grid steps so both TensorCores get batch work.
        steps = max(steps, cores)
    tb = _round_up(pl.cdiv(B, steps), 8)          # f32 sublane multiple
    grid_steps = pl.cdiv(B, tb)
    b_pad = grid_steps * tb
    if b_pad != B:
        x = jnp.pad(x, ((0, b_pad - B), (0, 0)))

    # Small batches: lane-dense 128-wide output (full-lane vst).
    # Large batches: true-width output to avoid 64x inflated HBM writeback.
    narrow = b_pad > 512
    out_w = n_out if narrow else _LANE

    flops = 2 * b_pad * (n_in * _LANE + _LANE * _LANE + _LANE * _LANE)
    bytes_accessed = (
        x.dtype.itemsize * b_pad * n_in
        + wslab.size * wslab.dtype.itemsize
        + bpack.size * 4
        + 4 * b_pad * out_w
    )

    out = pl.pallas_call(
        _make_kernel(n_in, out_w, wslab.dtype),
        out_shape=jax.ShapeDtypeStruct((b_pad, out_w), jnp.float32),
        grid=(grid_steps,),
        in_specs=[
            pl.BlockSpec((tb, n_in), lambda i: (i, 0)),          # x: tiled over batch
            pl.BlockSpec((3 * _LANE, _LANE), lambda i: (0, 0)),  # weight slab: resident
            pl.BlockSpec((8, _LANE), lambda i: (0, 0)),          # bias pack: resident
        ],
        out_specs=pl.BlockSpec((tb, out_w), lambda i: (i, 0)),
        compiler_params=pltpu.CompilerParams(
            dimension_semantics=("parallel",),
        ),
        cost_estimate=pl.CostEstimate(
            flops=flops, transcendentals=0, bytes_accessed=bytes_accessed
        ),
    )(x, wslab, bpack)

    if narrow:
        return out if b_pad == B else out[:B]
    return out[:B, :n_out]


def init_params(key, n_input=18, n_first=128, n_second=64, n_third=2):
    """Deterministic synthetic parameters."""
    # TODO(synk): original module loads f{1,2,3}_{weight,bias}.npy from disk;
    # replaced here with torch-default-style random init (no file I/O allowed).
    ks = jax.random.split(key, 6)

    def linear(kw, kb, fan_in, fan_out):
        bound = 1.0 / jnp.sqrt(fan_in)
        # torch stores (out, in); transpose to (in, out) for x @ W
        w = jax.random.uniform(kw, (fan_out, fan_in), jnp.float32, -bound, bound).T
        b = jax.random.uniform(kb, (1, fan_out), jnp.float32, -bound, bound)
        return w, b

    w1, b1 = linear(ks[0], ks[1], n_input, n_first)
    w2, b2 = linear(ks[2], ks[3], n_first, n_second)
    w3, b3 = linear(ks[4], ks[5], n_second, n_third)
    return dict(w1=w1, b1=b1, w2=w2, b2=b2, w3=w3, b3=b3)


def reference_forward(x, p):
    h1 = jnp.maximum(x @ p["w1"] + p["b1"], 0.0)
    h2 = jnp.maximum(h1 @ p["w2"] + p["b2"], 0.0)
    return h2 @ p["w3"] + p["b3"]


if __name__ == "__main__":
    key = jax.random.PRNGKey(0)
    k_param, k_x = jax.random.split(key)

    B, n_input = 8, 18
    params = init_params(k_param, n_input=n_input)

    # One-time parameter preparation (hoisted out of the forward path).
    prep_f32 = prepare_params(params)

    x = jax.random.normal(k_x, (B, n_input), dtype=jnp.float32)

    # Typical RL usage: jit with the prepared params closed over (constants).
    fwd = jax.jit(lambda xx: network_forward(xx, prep_f32))
    out = jax.block_until_ready(fwd(x))
    ref = reference_forward(x, params)
    assert out.shape == (B, 2)
    assert jnp.allclose(out, ref, atol=1e-5, rtol=1e-5)

    # Batch that is not a multiple of the block size (multi-step grid + padding).
    x_big = jax.random.normal(jax.random.PRNGKey(1), (37, n_input), dtype=jnp.float32)
    out_big = jax.block_until_ready(network_forward(x_big, prep_f32, block_b=16))
    ref_big = reference_forward(x_big, params)
    assert out_big.shape == (37, 2)
    assert jnp.allclose(out_big, ref_big, atol=1e-5, rtol=1e-5)

    # Large batch: exercises the narrow (true-width) output writeback path.
    x_large = jax.random.normal(jax.random.PRNGKey(2), (1000, n_input), dtype=jnp.float32)
    out_large = jax.block_until_ready(network_forward(x_large, prep_f32))
    ref_large = reference_forward(x_large, params)
    assert out_large.shape == (1000, 2)
    assert jnp.allclose(out_large, ref_large, atol=1e-4, rtol=1e-4)

    # Optional bf16-weight path (v6e/v7x DMA + MXU-pass savings); f32 accumulate.
    prep_bf16 = prepare_params(params, compute_dtype=jnp.bfloat16)
    out_bf16 = jax.block_until_ready(network_forward(x, prep_bf16))
    assert out_bf16.shape == (B, 2)
    assert jnp.allclose(out_bf16, ref, atol=5e-2, rtol=5e-2)

    print("KERNEL_OK")
</pallas_src>

<mosaic_0001>
module attributes {stable_mosaic.version = 11 : i64} {
  func.func @kernel(%arg0: i32, %arg1: memref<8x18xf32, #tpu.memory_space<vmem>>, %arg2: memref<384x128xf32, #tpu.memory_space<vmem>>, %arg3: memref<8x128xf32, #tpu.memory_space<vmem>>, %arg4: memref<8x128xf32, #tpu.memory_space<vmem>>) attributes {dimension_semantics = [#tpu.dimension_semantics<parallel>], iteration_bounds = array<i64: 1>, scalar_prefetch = 0 : i64, scratch_operands = 0 : i64, tpu.core_type = #tpu.core_type<tc>, window_params = [{transform_indices = @transform_0, window_bounds = array<i64: 8, 18>}, {pipeline_mode = #tpu.pipeline_mode<synchronous>, transform_indices = @transform_1, window_bounds = array<i64: 384, 128>}, {pipeline_mode = #tpu.pipeline_mode<synchronous>, transform_indices = @transform_2, window_bounds = array<i64: 8, 128>}, {transform_indices = @transform_3, window_bounds = array<i64: 8, 128>}]} {
    %c0 = arith.constant 0 : index
    %c0_0 = arith.constant 0 : index
    %0 = vector.load %arg1[%c0, %c0_0] : memref<8x18xf32, #tpu.memory_space<vmem>>, vector<8x18xf32>
    %c0_1 = arith.constant 0 : index
    %c0_2 = arith.constant 0 : index
    %1 = vector.load %arg2[%c0_1, %c0_2] : memref<384x128xf32, #tpu.memory_space<vmem>>, vector<18x128xf32>
    %c128 = arith.constant 128 : index
    %c0_3 = arith.constant 0 : index
    %2 = vector.load %arg2[%c128, %c0_3] : memref<384x128xf32, #tpu.memory_space<vmem>>, vector<128x128xf32>
    %c256 = arith.constant 256 : index
    %c0_4 = arith.constant 0 : index
    %3 = vector.load %arg2[%c256, %c0_4] : memref<384x128xf32, #tpu.memory_space<vmem>>, vector<128x128xf32>
    %c0_5 = arith.constant 0 : index
    %c0_6 = arith.constant 0 : index
    %4 = vector.load %arg3[%c0_5, %c0_6] : memref<8x128xf32, #tpu.memory_space<vmem>>, vector<1x128xf32>
    %c1 = arith.constant 1 : index
    %c0_7 = arith.constant 0 : index
    %5 = vector.load %arg3[%c1, %c0_7] : memref<8x128xf32, #tpu.memory_space<vmem>>, vector<1x128xf32>
    %c2 = arith.constant 2 : index
    %c0_8 = arith.constant 0 : index
    %6 = vector.load %arg3[%c2, %c0_8] : memref<8x128xf32, #tpu.memory_space<vmem>>, vector<1x128xf32>
    %cst = arith.constant dense<0.000000e+00> : vector<8x128xf32>
    %7 = tpu.matmul %0, %1, %cst {dimension_numbers = #tpu.dot_dimension_numbers<[1], [0], [0], [1], [0, 0, 1, 1], [], []>} : vector<8x18xf32>, vector<18x128xf32>, vector<8x128xf32> -> vector<8x128xf32>
    %8 = vector.broadcast %4 : vector<1x128xf32> to vector<8x128xf32>
    %9 = arith.addf %7, %8 : vector<8x128xf32>
    %cst_9 = arith.constant 0.000000e+00 : f32
    %10 = vector.broadcast %cst_9 : f32 to vector<8x128xf32>
    %11 = arith.maximumf %9, %10 : vector<8x128xf32>
    %cst_10 = arith.constant dense<0.000000e+00> : vector<8x128xf32>
    %12 = tpu.matmul %11, %2, %cst_10 {dimension_numbers = #tpu.dot_dimension_numbers<[1], [0], [0], [1], [0, 0, 1, 1], [], []>} : vector<8x128xf32>, vector<128x128xf32>, vector<8x128xf32> -> vector<8x128xf32>
    %13 = vector.broadcast %5 : vector<1x128xf32> to vector<8x128xf32>
    %14 = arith.addf %12, %13 : vector<8x128xf32>
    %cst_11 = arith.constant 0.000000e+00 : f32
    %15 = vector.broadcast %cst_11 : f32 to vector<8x128xf32>
    %16 = arith.maximumf %14, %15 : vector<8x128xf32>
    %cst_12 = arith.constant dense<0.000000e+00> : vector<8x128xf32>
    %17 = tpu.matmul %16, %3, %cst_12 {dimension_numbers = #tpu.dot_dimension_numbers<[1], [0], [0], [1], [0, 0, 1, 1], [], []>} : vector<8x128xf32>, vector<128x128xf32>, vector<8x128xf32> -> vector<8x128xf32>
    %18 = vector.broadcast %6 : vector<1x128xf32> to vector<8x128xf32>
    %19 = arith.addf %17, %18 : vector<8x128xf32>
    %c0_13 = arith.constant 0 : index
    %c0_14 = arith.constant 0 : index
    %20 = vector.load %arg4[%c0_13, %c0_14] : memref<8x128xf32, #tpu.memory_space<vmem>>, vector<8x128xf32>
    tpu.vector_store %arg4[%c0_13, %c0_14], %19 {strides = array<i32>} : memref<8x128xf32, #tpu.memory_space<vmem>>, vector<8x128xf32>,
    return
  }
  func.func @transform_0(%arg0: i32) -> (i32, i32) {
    %c0_i32 = arith.constant 0 : i32
    %c0_i32_0 = arith.constant 0 : i32
    return %arg0, %c0_i32 : i32, i32
  }
  func.func @transform_1(%arg0: i32) -> (i32, i32) {
    %c0_i32 = arith.constant 0 : i32
    %c0_i32_0 = arith.constant 0 : i32
    %c0_i32_1 = arith.constant 0 : i32
    return %c0_i32, %c0_i32_0 : i32, i32
  }
  func.func @transform_2(%arg0: i32) -> (i32, i32) {
    %c0_i32 = arith.constant 0 : i32
    %c0_i32_0 = arith.constant 0 : i32
    %c0_i32_1 = arith.constant 0 : i32
    return %c0_i32, %c0_i32_0 : i32, i32
  }
  func.func @transform_3(%arg0: i32) -> (i32, i32) {
    %c0_i32 = arith.constant 0 : i32
    %c0_i32_0 = arith.constant 0 : i32
    return %arg0, %c0_i32 : i32, i32
  }
}

</mosaic_0001>

<bundles_post_ra>
// kernel: _lambda_.1
= control target key start
LH: loop header
LB: loop body
LE: loop exit
PB: predicated region body
PF: predicated region fallthrough
CT: control target
= control target key end

     0   :  { %8 = vsyncpa [#allocation3], 0  ;;  %s299_s0 = inlined_call_operand.hbm [shape: f32[8,18], index: 0, kind: input, shape index: {}]   ;;  %s300_s1 = inlined_call_operand.hbm [shape: f32[384,128], index: 1, kind: input, shape index: {}]   ;;  %s301_s2 = inlined_call_operand.hbm [shape: f32[8,128], index: 2, kind: input, shape index: {}]   ;;  %s302_s3 = inlined_call_operand.vmem [shape: f32[8,128], index: 3, kind: output, shape index: {}]  }
   0x1   :  { %9 = vsyncpa [#allocation5], 0  ;;  %s25_s14 = sshll.u32 %s300_s1, 4  ;;  %s262_s15 = smov [#allocation4]   ;;  %s26_s14 = int_to_ptr.hbm [resolvable:$true] %s25_s14 }
   0x2   :  { %s27_s16 = sshll.u32 %s262_s15, 4  ;;  %s15_s19 = sshll.u32 %s299_s0, 4  ;;  %s28_s16 = int_to_ptr.vmem [resolvable:$true] %s27_s16  ;;  %s16_s19 = int_to_ptr.hbm [resolvable:$true] %s15_s19 }
   0x3   :  { %s263_s20 = smov 128   ;;  %s264_s21 = smov 8  }
   0x4   :  { %33 = dma.hbm_to_vmem [thread:$0]  %s26_s14, 6144, %s28_s16, [#allocation5], %s263_s20, %s263_s20, %s264_s21  }
   0x5   :  { %s265_s22 = smov [#allocation2]   ;;  %s39_s26 = sshll.u32 %s301_s2, 4  ;;  %s40_s26 = int_to_ptr.hbm [resolvable:$true] %s39_s26 }
   0x6   :  { %s17_s23 = sshll.u32 %s265_s22, 4  ;;  %s266_s1 = smov [#allocation6]   ;;  %s18_s23 = int_to_ptr.vmem [resolvable:$true] %s17_s23 }
   0x7   :  { %20 = dma.hbm_to_vmem [thread:$0]  %s16_s19, 128, %s18_s23, [#allocation3]  }
   0x8   :  { %s41_s27 = sshll.u32 %s266_s1, 4  ;;  %s42_s27 = int_to_ptr.vmem [resolvable:$true] %s41_s27 }
   0x9   :  { %44 = dma.hbm_to_vmem [thread:$0]  %s40_s26, 128, %s42_s27, [#allocation5]  }
   0xa   :  { %258 = dma.done.wait [#allocation3], 128  }
   0xb   :  { %259 = vsyncadd [#allocation3], 4294967168 }
   0xc   :  { %260 = dma.done.wait [#allocation5], 6272  }
   0xd   :  { %261 = vsyncadd [#allocation5], 4294961024  ;;  %vm101_vm0 = vcmask 1041408   ;;  %v60_v0 = vld [vmem:[#allocation4 + $0x10] sm:$0x3]  ;;  %v59_v1 = vld [vmem:[#allocation4 + $0x8] sm:$0xff] }
   0xe   :  { %176 = vmatpush.msk.msra.mxu0 %vm101_vm0, %v60_v0  ;;  %v76_v2 = vld [vmem:[#allocation4 + $0xf8] sm:$0xff]  ;;  %v75_v3 = vld [vmem:[#allocation4 + $0xf0] sm:$0xff]  ;;  %v58_v4 = vld [vmem:[#allocation4] sm:$0xff]  ;;  %vm97_vm1 = vcmask 146432  }
   0xf   :  { %127 = vmatpush.msra.mxu1 %v76_v2  ;;  %v57_v5 = vld [vmem:[#allocation2] sm:$0xff]  ;;  %v74_v6 = vld [vmem:[#allocation4 + $0xe8] sm:$0xff]  ;;  %v73_v7 = vld [vmem:[#allocation4 + $0xe0] sm:$0xff] }
  0x10   :  { %119 = vmatpush.msra.mxu0 %v59_v1  ;;  %v72_v8 = vld [vmem:[#allocation4 + $0xd8] sm:$0xff]  ;;  %v71_v9 = vld [vmem:[#allocation4 + $0xd0] sm:$0xff]  ;;  %v70_v10 = vld [vmem:[#allocation4 + $0xc8] sm:$0xff] }
  0x11   :  { %128 = vmatpush.msra.mxu1 %v75_v3  ;;  %v69_v11 = vld [vmem:[#allocation4 + $0xc0] sm:$0xff]  ;;  %v68_v12 = vld [vmem:[#allocation4 + $0xb8] sm:$0xff]  ;;  %v67_v13 = vld [vmem:[#allocation4 + $0xb0] sm:$0xff] }
  0x12   :  { %120 = vmatpush.msra.mxu0 %v58_v4  ;;  %v66_v14 = vld [vmem:[#allocation4 + $0xa8] sm:$0xff]  ;;  %v65_v15 = vld [vmem:[#allocation4 + $0xa0] sm:$0xff]  ;;  %v64_v16 = vld [vmem:[#allocation4 + $0x98] sm:$0xff] }
  0x13   :  { %177 = vmatmul.msk.f32.vlgmr.msra.gmra.mxu0 %vm97_vm1, %v57_v5  ;;  %129 = vmatpush.msra.mxu1 %v74_v6  ;;  %v63_v17 = vld [vmem:[#allocation4 + $0x90] sm:$0xff]  ;;  %v62_v18 = vld [vmem:[#allocation4 + $0x88] sm:$0xff]  ;;  %v61_v19 = vld [vmem:[#allocation4 + $0x80] sm:$0xff] }
  0x14   :  { %v92_v20 = vld [vmem:[#allocation4 + $0x178] sm:$0xff]  ;;  %v91_v21 = vld [vmem:[#allocation4 + $0x170] sm:$0xff]  ;;  %v90_v22 = vld [vmem:[#allocation4 + $0x168] sm:$0xff] }
  0x15   :  { %130 = vmatpush.msra.mxu1 %v73_v7  ;;  %149 = vmatpush.msra.mxu2 %v92_v20  ;;  %v89_v23 = vld [vmem:[#allocation4 + $0x160] sm:$0xff]  ;;  %v88_v24 = vld [vmem:[#allocation4 + $0x158] sm:$0xff]  ;;  %v87_v25 = vld [vmem:[#allocation4 + $0x150] sm:$0xff] }
  0x16   :  { %v86_v26 = vld [vmem:[#allocation4 + $0x148] sm:$0xff]  ;;  %v85_v27 = vld [vmem:[#allocation4 + $0x140] sm:$0xff]  ;;  %v84_v28 = vld [vmem:[#allocation4 + $0x138] sm:$0xff] }
  0x17   :  { %131 = vmatpush.msra.mxu1 %v72_v8  ;;  %150 = vmatpush.msra.mxu2 %v91_v21  ;;  %v83_v29 = vld [vmem:[#allocation4 + $0x130] sm:$0xff]  ;;  %v82_v30 = vld [vmem:[#allocation4 + $0x128] sm:$0xff]  ;;  %v81_v31 = vld [vmem:[#allocation4 + $0x120] sm:$0xff] }
  0x18   :  { %v80_v32 = vld [vmem:[#allocation4 + $0x118] sm:$0xff]  ;;  %v183_v33 = vld [vmem:[#allocation6] ss:$0 sm:$0xff]  ;;  %v79_v37 = vld [vmem:[#allocation4 + $0x110] sm:$0xff] }
  0x19   :  { %132 = vmatpush.msra.mxu1 %v71_v9  ;;  %151 = vmatpush.msra.mxu2 %v90_v22  ;;  %v78_v38 = vld [vmem:[#allocation4 + $0x108] sm:$0xff]  ;;  %v77_v39 = vld [vmem:[#allocation4 + $0x100] sm:$0xff] }
  0x1a   :  { %v184_v40 = vld [vmem:[#allocation6 + $0x1] ss:$0 sm:$0xff]  ;;  %v185_v44 = vld [vmem:[#allocation6 + $0x2] ss:$0 sm:$0xff] }
  0x1b   :  { %133 = vmatpush.msra.mxu1 %v70_v10  ;;  %152 = vmatpush.msra.mxu2 %v89_v23 }
  0x1d   :  { %134 = vmatpush.msra.mxu1 %v69_v11  ;;  %153 = vmatpush.msra.mxu2 %v88_v24 }
  0x1f   :  { %135 = vmatpush.msra.mxu1 %v68_v12  ;;  %154 = vmatpush.msra.mxu2 %v87_v25 }
  0x21   :  { %136 = vmatpush.msra.mxu1 %v67_v13  ;;  %155 = vmatpush.msra.mxu2 %v86_v26 }
  0x23   :  { %137 = vmatpush.msra.mxu1 %v66_v14  ;;  %156 = vmatpush.msra.mxu2 %v85_v27 }
  0x25   :  { %138 = vmatpush.msra.mxu1 %v65_v15  ;;  %157 = vmatpush.msra.mxu2 %v84_v28 }
  0x27   :  { %139 = vmatpush.msra.mxu1 %v64_v16  ;;  %158 = vmatpush.msra.mxu2 %v83_v29 }
  0x29   :  { %140 = vmatpush.msra.mxu1 %v63_v17  ;;  %159 = vmatpush.msra.mxu2 %v82_v30 }
  0x2b   :  { %141 = vmatpush.msra.mxu1 %v62_v18  ;;  %160 = vmatpush.msra.mxu2 %v81_v31 }
  0x2d   :  { %142 = vmatpush.msra.mxu1 %v61_v19  ;;  %161 = vmatpush.msra.mxu2 %v80_v32 }
  0x2f   :  { %162 = vmatpush.msra.mxu2 %v79_v37 }
  0x31   :  { %163 = vmatpush.msra.mxu2 %v78_v38 }
  0x33   :  { %164 = vmatpush.msra.mxu2 %v77_v39 }
  0x90   :  { %v122_v34 = vpop.f32.mrf.mxu0 }
  0x91   :  { %v123_v35 = vadd.f32 %v183_v33, %v122_v34 }
  0x93   :  { %v125_v36 = vmax.f32 %v123_v35, 0.0 }
  0x95   :  { %143 = vmatmul.f32.vlgmr.msra.gmra.mxu1 %v125_v36 }
 0x112   :  { %v144_v41 = vpop.f32.mrf.mxu1 }
 0x113   :  { %v145_v42 = vadd.f32 %v184_v40, %v144_v41 }
 0x115   :  { %v147_v43 = vmax.f32 %v145_v42, 0.0 }
 0x117   :  { %165 = vmatmul.f32.vlgmr.msra.gmra.mxu2 %v147_v43 }
 0x19a   :  { %v166_v45 = vpop.f32.mrf.mxu2 }
 0x19b   :  { %v167_v46 = vadd.f32 %v185_v44, %v166_v45 }
 0x19d   :  { %169 = vst [vmem:[%s302_s3] sm:$0xff] %v167_v46 }
 0x19e   :  { %174 = vsyncpa [#allocation3], 1 }
 0x19f   :  { %175 = vsyncpa [#allocation5], 1 }

</bundles_post_ra>
